<compile_context>
chip_gen: v5e
topology: v5e:2x2
jax: 0.10.0
libtpu: 0.0.40
codegen_flags: <defaults>
</compile_context>

<pallas_src>
import math

import jax
import jax.numpy as jnp
from jax.experimental import pallas as pl
from jax.experimental.pallas import tpu as pltpu


def embeddings_kernel(t_ref, c_ref, m_ref, freq_ref,
                      wt1_ref, bt1_ref, wt2_ref, bt2_ref,
                      wc1_ref, bc1_ref, wc2_ref, bc2_ref,
                      t_out_ref, c_out_ref):
    """
    t_ref    : VMEM (B, 1)  f32   diffusion timesteps
    c_ref    : VMEM (B, 1)  i32   class labels
    m_ref    : VMEM (B, 1)  f32   drop mask (1 = drop condition)
    freq_ref : VMEM (1, H)  f32   sinusoidal frequencies, H = time_channels // 8
    wt1_ref  : VMEM (2H, C)       == TimeEmbedding.lin1.weight.T
    bt1_ref  : VMEM (1, C)
    wt2_ref  : VMEM (C, C)        == TimeEmbedding.lin2.weight.T
    bt2_ref  : VMEM (1, C)
    wc1_ref  : VMEM (NP, C)       == ClassEmbedding.lin1.weight.T, zero-padded rows
    bc1_ref  : VMEM (1, C)
    wc2_ref  : VMEM (C, C)        == ClassEmbedding.lin2.weight.T
    bc2_ref  : VMEM (1, C)
    t_out_ref, c_out_ref : VMEM (B, C)
    """
    B = t_out_ref.shape[0]

    # --- time embedding -----------------------------------------------------
    arg = t_ref[...] * freq_ref[...]                                   # (B, H)
    sincos = jnp.concatenate([jnp.sin(arg), jnp.cos(arg)], axis=1)     # (B, 2H)
    ht = jnp.dot(sincos, wt1_ref[...],
                 preferred_element_type=jnp.float32) + bt1_ref[...]
    ht = ht * jax.nn.sigmoid(ht)                                       # SiLU (EUP)
    t_emb = jnp.dot(ht, wt2_ref[...],
                    preferred_element_type=jnp.float32) + bt2_ref[...]
    t_out_ref[...] = t_emb.astype(t_out_ref.dtype)

    # --- class embedding ----------------------------------------------------
    # one_hot(c) * (-1 * (1 - drop_mask)) built directly in registers, then a
    # single (B, NP) x (NP, C) MXU dot.  Columns >= n_classes (padding) are 0,
    # so out-of-range labels simply give a zero pre-activation row.
    NP = wc1_ref.shape[0]
    m_col = -1.0 * (1.0 - m_ref[...])                                  # (B, 1)
    lane = jax.lax.broadcasted_iota(jnp.int32, (B, NP), 1)             # (B, NP)
    onehot = jnp.where(lane == c_ref[...], m_col, 0.0)                 # (B, NP)
    hc = jnp.dot(onehot, wc1_ref[...],
                 preferred_element_type=jnp.float32) + bc1_ref[...]
    hc = hc * jax.nn.sigmoid(hc)
    c_emb = jnp.dot(hc, wc2_ref[...],
                    preferred_element_type=jnp.float32) + bc2_ref[...]
    c_out_ref[...] = c_emb.astype(c_out_ref.dtype)


def unet_embeddings(t, c, drop_mask,
                    tw1, tb1, tw2, tb2,
                    cw1, cb1, cw2, cb2):
    """Fused TimeEmbedding(t) and ClassEmbedding(c, drop_mask).

    Linear weights are stored transposed relative to PyTorch:
    (in_features, out_features).  Returns (t_emb, c_emb), each (B, C) float32.
    """
    B = t.shape[0]
    C = tw2.shape[0]                       # time_channels
    half = C // 8                          # sinusoidal half-dim
    n_classes = cw1.shape[0]
    NP = max(8, -(-n_classes // 8) * 8)    # pad classes to a sublane multiple

    freqs = jnp.exp(
        jnp.arange(half, dtype=jnp.float32) * -(math.log(10000.0) / (half - 1))
    ).reshape(1, half)

    f32 = jnp.float32
    t2d = t.astype(f32).reshape(B, 1)
    c2d = c.astype(jnp.int32).reshape(B, 1)
    m2d = drop_mask.astype(f32).reshape(B, 1)

    cw1p = jnp.zeros((NP, C), f32).at[:n_classes].set(cw1.astype(f32))

    args = (t2d, c2d, m2d, freqs,
            tw1.astype(f32), tb1.reshape(1, C).astype(f32),
            tw2.astype(f32), tb2.reshape(1, C).astype(f32),
            cw1p, cb1.reshape(1, C).astype(f32),
            cw2.astype(f32), cb2.reshape(1, C).astype(f32))

    # Advisory cost estimate so XLA schedules/overlaps this tiny call freely.
    flops = 2 * B * (2 * half) * C + 2 * B * NP * C + 2 * (2 * B * C * C)
    transcendentals = 2 * B * half + 2 * B * C
    bytes_accessed = 4 * (sum(int(a.size) for a in args) + 2 * B * C)

    vmem = pl.BlockSpec(memory_space=pltpu.MemorySpace.VMEM)

    t_emb, c_emb = pl.pallas_call(
        embeddings_kernel,
        out_shape=(jax.ShapeDtypeStruct((B, C), jnp.float32),
                   jax.ShapeDtypeStruct((B, C), jnp.float32)),
        in_specs=[vmem] * len(args),
        out_specs=(vmem, vmem),
        cost_estimate=pl.CostEstimate(flops=flops,
                                      transcendentals=transcendentals,
                                      bytes_accessed=bytes_accessed),
    )(*args)
    return t_emb, c_emb


# ---------------------------- pure-JAX references ----------------------------

def time_embedding_ref(t, w1, b1, w2, b2):
    C = w2.shape[0]
    half = C // 8
    freqs = jnp.exp(jnp.arange(half, dtype=jnp.float32)
                    * -(math.log(10000.0) / (half - 1)))
    arg = t.astype(jnp.float32)[:, None] * freqs[None, :]
    emb = jnp.concatenate([jnp.sin(arg), jnp.cos(arg)], axis=1)
    h = emb @ w1 + b1
    h = h * jax.nn.sigmoid(h)
    return h @ w2 + b2


def class_embedding_ref(c, drop_mask, w1, b1, w2, b2):
    n_classes = w1.shape[0]
    one_hot = jax.nn.one_hot(c, n_classes, dtype=jnp.float32)
    m = -1.0 * (1.0 - drop_mask.astype(jnp.float32)[:, None])
    x = one_hot * m
    h = x @ w1 + b1
    h = h * jax.nn.sigmoid(h)
    return h @ w2 + b2


if __name__ == "__main__":
    # Shapes consistent with UNet(n_channels=32, n_classes=10):
    #   time_channels = 4 * 32 = 128  -> lane-dense (B, 128) outputs.
    B, n_classes, C = 8, 10, 128

    key = jax.random.PRNGKey(0)
    keys = jax.random.split(key, 11)

    t = jax.random.randint(keys[0], (B,), 0, 100).astype(jnp.float32)
    c = jax.random.randint(keys[1], (B,), 0, n_classes, dtype=jnp.int32)
    drop_mask = jax.random.bernoulli(keys[2], 0.3, (B,)).astype(jnp.float32)

    # PyTorch-Linear parameters, stored transposed (in_features, out_features).
    tw1 = jax.random.normal(keys[3], (C // 4, C), jnp.float32) * 0.1
    tb1 = jax.random.normal(keys[4], (C,), jnp.float32) * 0.1
    tw2 = jax.random.normal(keys[5], (C, C), jnp.float32) * 0.1
    tb2 = jax.random.normal(keys[6], (C,), jnp.float32) * 0.1
    cw1 = jax.random.normal(keys[7], (n_classes, C), jnp.float32) * 0.1
    cb1 = jax.random.normal(keys[8], (C,), jnp.float32) * 0.1
    cw2 = jax.random.normal(keys[9], (C, C), jnp.float32) * 0.1
    cb2 = jax.random.normal(keys[10], (C,), jnp.float32) * 0.1

    t_emb, c_emb = unet_embeddings(t, c, drop_mask,
                                   tw1, tb1, tw2, tb2,
                                   cw1, cb1, cw2, cb2)
    t_emb, c_emb = jax.block_until_ready((t_emb, c_emb))

    t_want = time_embedding_ref(t, tw1, tb1, tw2, tb2)
    c_want = class_embedding_ref(c, drop_mask, cw1, cb1, cw2, cb2)

    assert t_emb.shape == (B, C) and c_emb.shape == (B, C)
    assert jnp.allclose(c_emb, c_want, atol=1e-5, rtol=1e-5)
    assert jnp.allclose(t_emb, t_want, atol=1e-4, rtol=1e-4)

    print("KERNEL_OK")
</pallas_src>

<mosaic_0001>
module attributes {stable_mosaic.version = 11 : i64} {
  func.func @embeddings_kernel(%arg0: memref<8x1xf32, #tpu.memory_space<vmem>>, %arg1: memref<8x1xi32, #tpu.memory_space<vmem>>, %arg2: memref<8x1xf32, #tpu.memory_space<vmem>>, %arg3: memref<1x16xf32, #tpu.memory_space<vmem>>, %arg4: memref<32x128xf32, #tpu.memory_space<vmem>>, %arg5: memref<1x128xf32, #tpu.memory_space<vmem>>, %arg6: memref<128x128xf32, #tpu.memory_space<vmem>>, %arg7: memref<1x128xf32, #tpu.memory_space<vmem>>, %arg8: memref<16x128xf32, #tpu.memory_space<vmem>>, %arg9: memref<1x128xf32, #tpu.memory_space<vmem>>, %arg10: memref<128x128xf32, #tpu.memory_space<vmem>>, %arg11: memref<1x128xf32, #tpu.memory_space<vmem>>, %arg12: memref<8x128xf32, #tpu.memory_space<vmem>>, %arg13: memref<8x128xf32, #tpu.memory_space<vmem>>) attributes {dimension_semantics = [], scalar_prefetch = 0 : i64, scratch_operands = 0 : i64, tpu.core_type = #tpu.core_type<tc>} {
    %c0 = arith.constant 0 : index
    %c0_0 = arith.constant 0 : index
    %0 = vector.load %arg0[%c0, %c0_0] : memref<8x1xf32, #tpu.memory_space<vmem>>, vector<8x1xf32>
    %c0_1 = arith.constant 0 : index
    %c0_2 = arith.constant 0 : index
    %1 = vector.load %arg3[%c0_1, %c0_2] : memref<1x16xf32, #tpu.memory_space<vmem>>, vector<1x16xf32>
    %2 = vector.broadcast %0 : vector<8x1xf32> to vector<8x16xf32>
    %3 = vector.broadcast %1 : vector<1x16xf32> to vector<8x16xf32>
    %4 = arith.mulf %2, %3 : vector<8x16xf32>
    %5 = math.sin %4 : vector<8x16xf32>
    %6 = math.cos %4 : vector<8x16xf32>
    %7 = tpu.concatenate %5, %6 in 1 : vector<8x16xf32>, vector<8x16xf32> -> vector<8x32xf32>
    %c0_3 = arith.constant 0 : index
    %c0_4 = arith.constant 0 : index
    %8 = vector.load %arg4[%c0_3, %c0_4] : memref<32x128xf32, #tpu.memory_space<vmem>>, vector<32x128xf32>
    %cst = arith.constant dense<0.000000e+00> : vector<8x128xf32>
    %9 = tpu.matmul %7, %8, %cst {dimension_numbers = #tpu.dot_dimension_numbers<[1], [0], [0], [1], [0, 0, 1, 1], [], []>} : vector<8x32xf32>, vector<32x128xf32>, vector<8x128xf32> -> vector<8x128xf32>
    %c0_5 = arith.constant 0 : index
    %c0_6 = arith.constant 0 : index
    %10 = vector.load %arg5[%c0_5, %c0_6] : memref<1x128xf32, #tpu.memory_space<vmem>>, vector<1x128xf32>
    %11 = vector.broadcast %10 : vector<1x128xf32> to vector<8x128xf32>
    %12 = arith.addf %9, %11 : vector<8x128xf32>
    %13 = arith.negf %12 : vector<8x128xf32>
    %14 = math.exp %13 : vector<8x128xf32>
    %cst_7 = arith.constant 1.000000e+00 : f32
    %15 = vector.broadcast %cst_7 : f32 to vector<8x128xf32>
    %16 = arith.addf %15, %14 : vector<8x128xf32>
    %17 = arith.divf %15, %16 : vector<8x128xf32>
    %18 = arith.mulf %12, %17 : vector<8x128xf32>
    %c0_8 = arith.constant 0 : index
    %c0_9 = arith.constant 0 : index
    %19 = vector.load %arg6[%c0_8, %c0_9] : memref<128x128xf32, #tpu.memory_space<vmem>>, vector<128x128xf32>
    %cst_10 = arith.constant dense<0.000000e+00> : vector<8x128xf32>
    %20 = tpu.matmul %18, %19, %cst_10 {dimension_numbers = #tpu.dot_dimension_numbers<[1], [0], [0], [1], [0, 0, 1, 1], [], []>} : vector<8x128xf32>, vector<128x128xf32>, vector<8x128xf32> -> vector<8x128xf32>
    %c0_11 = arith.constant 0 : index
    %c0_12 = arith.constant 0 : index
    %21 = vector.load %arg7[%c0_11, %c0_12] : memref<1x128xf32, #tpu.memory_space<vmem>>, vector<1x128xf32>
    %22 = vector.broadcast %21 : vector<1x128xf32> to vector<8x128xf32>
    %23 = arith.addf %20, %22 : vector<8x128xf32>
    %c0_13 = arith.constant 0 : index
    %c0_14 = arith.constant 0 : index
    %24 = vector.load %arg12[%c0_13, %c0_14] : memref<8x128xf32, #tpu.memory_space<vmem>>, vector<8x128xf32>
    tpu.vector_store %arg12[%c0_13, %c0_14], %23 {strides = array<i32>} : memref<8x128xf32, #tpu.memory_space<vmem>>, vector<8x128xf32>,
    %c0_15 = arith.constant 0 : index
    %c0_16 = arith.constant 0 : index
    %25 = vector.load %arg2[%c0_15, %c0_16] : memref<8x1xf32, #tpu.memory_space<vmem>>, vector<8x1xf32>
    %cst_17 = arith.constant 1.000000e+00 : f32
    %26 = vector.broadcast %cst_17 : f32 to vector<8x1xf32>
    %27 = arith.subf %26, %25 : vector<8x1xf32>
    %cst_18 = arith.constant -1.000000e+00 : f32
    %28 = vector.broadcast %cst_18 : f32 to vector<8x1xf32>
    %29 = arith.mulf %28, %27 : vector<8x1xf32>
    %30 = tpu.iota {dimensions = array<i32: 1>} : vector<8x16xi32>
    %c0_19 = arith.constant 0 : index
    %c0_20 = arith.constant 0 : index
    %31 = vector.load %arg1[%c0_19, %c0_20] : memref<8x1xi32, #tpu.memory_space<vmem>>, vector<8x1xi32>
    %32 = vector.broadcast %31 : vector<8x1xi32> to vector<8x16xi32>
    %33 = arith.cmpi eq, %30, %32 : vector<8x16xi32>
    %cst_21 = arith.constant 0.000000e+00 : f32
    %34 = vector.shape_cast %29 : vector<8x1xf32> to vector<8x1xf32>
    %35 = vector.broadcast %34 : vector<8x1xf32> to vector<8x16xf32>
    %36 = vector.broadcast %cst_21 : f32 to vector<8x16xf32>
    %37 = arith.select %33, %35, %36 : vector<8x16xi1>, vector<8x16xf32>
    %c0_22 = arith.constant 0 : index
    %c0_23 = arith.constant 0 : index
    %38 = vector.load %arg8[%c0_22, %c0_23] : memref<16x128xf32, #tpu.memory_space<vmem>>, vector<16x128xf32>
    %cst_24 = arith.constant dense<0.000000e+00> : vector<8x128xf32>
    %39 = tpu.matmul %37, %38, %cst_24 {dimension_numbers = #tpu.dot_dimension_numbers<[1], [0], [0], [1], [0, 0, 1, 1], [], []>} : vector<8x16xf32>, vector<16x128xf32>, vector<8x128xf32> -> vector<8x128xf32>
    %c0_25 = arith.constant 0 : index
    %c0_26 = arith.constant 0 : index
    %40 = vector.load %arg9[%c0_25, %c0_26] : memref<1x128xf32, #tpu.memory_space<vmem>>, vector<1x128xf32>
    %41 = vector.broadcast %40 : vector<1x128xf32> to vector<8x128xf32>
    %42 = arith.addf %39, %41 : vector<8x128xf32>
    %43 = arith.negf %42 : vector<8x128xf32>
    %44 = math.exp %43 : vector<8x128xf32>
    %cst_27 = arith.constant 1.000000e+00 : f32
    %45 = vector.broadcast %cst_27 : f32 to vector<8x128xf32>
    %46 = arith.addf %45, %44 : vector<8x128xf32>
    %47 = arith.divf %45, %46 : vector<8x128xf32>
    %48 = arith.mulf %42, %47 : vector<8x128xf32>
    %c0_28 = arith.constant 0 : index
    %c0_29 = arith.constant 0 : index
    %49 = vector.load %arg10[%c0_28, %c0_29] : memref<128x128xf32, #tpu.memory_space<vmem>>, vector<128x128xf32>
    %cst_30 = arith.constant dense<0.000000e+00> : vector<8x128xf32>
    %50 = tpu.matmul %48, %49, %cst_30 {dimension_numbers = #tpu.dot_dimension_numbers<[1], [0], [0], [1], [0, 0, 1, 1], [], []>} : vector<8x128xf32>, vector<128x128xf32>, vector<8x128xf32> -> vector<8x128xf32>
    %c0_31 = arith.constant 0 : index
    %c0_32 = arith.constant 0 : index
    %51 = vector.load %arg11[%c0_31, %c0_32] : memref<1x128xf32, #tpu.memory_space<vmem>>, vector<1x128xf32>
    %52 = vector.broadcast %51 : vector<1x128xf32> to vector<8x128xf32>
    %53 = arith.addf %50, %52 : vector<8x128xf32>
    %c0_33 = arith.constant 0 : index
    %c0_34 = arith.constant 0 : index
    %54 = vector.load %arg13[%c0_33, %c0_34] : memref<8x128xf32, #tpu.memory_space<vmem>>, vector<8x128xf32>
    tpu.vector_store %arg13[%c0_33, %c0_34], %53 {strides = array<i32>} : memref<8x128xf32, #tpu.memory_space<vmem>>, vector<8x128xf32>,
    return
  }
}

</mosaic_0001>

<bundles_post_ra>
// kernel: tpu_custom_call.1
= control target key start
LH: loop header
LB: loop body
LE: loop exit
PB: predicated region body
PF: predicated region fallthrough
CT: control target
= control target key end

     0   :  { %19 = vsyncpa [#allocation3], 0  ;;  %s1006_s0 = inlined_call_operand.vmem [shape: f32[8,1], index: 0, kind: input, shape index: {}]   ;;  %s1007_s1 = inlined_call_operand.vmem [shape: s32[8,1], index: 1, kind: input, shape index: {}]   ;;  %s1008_s2 = inlined_call_operand.vmem [shape: f32[8,1], index: 2, kind: input, shape index: {}]   ;;  %s1009_s3 = inlined_call_operand.vmem [shape: f32[1,16], index: 3, kind: input, shape index: {}]   ;;  %s1010_s4 = inlined_call_operand.hbm [shape: f32[32,128], index: 4, kind: input, shape index: {}]   ;;  %s1011_s5 = inlined_call_operand.vmem [shape: f32[1,128], index: 5, kind: input, shape index: {}]   ;;  %s1012_s6 = inlined_call_operand.hbm [shape: f32[128,128], index: 6, kind: input, shape index: {}]   ;;  %s1013_s7 = inlined_call_operand.vmem [shape: f32[1,128], index: 7, kind: input, shape index: {}]   ;;  %s1014_s8 = inlined_call_operand.vmem [shape: f32[16,128], index: 8, kind: input, shape index: {}]   ;;  %s1015_s9 = inlined_call_operand.vmem [shape: f32[1,128], index: 9, kind: input, shape index: {}]   ;;  %s1016_s10 = inlined_call_operand.hbm [shape: f32[128,128], index: 10, kind: input, shape index: {}]   ;;  %s1017_s11 = inlined_call_operand.vmem [shape: f32[1,128], index: 11, kind: input, shape index: {}]   ;;  %s1018_s12 = inlined_call_operand.hbm [shape: f32[8,128], index: 12, kind: output, shape index: {0}]   ;;  %s1019_s13 = inlined_call_operand.hbm [shape: f32[8,128], index: 13, kind: output, shape index: {1}]  }
   0x1   :  { %20 = vsyncpa [#allocation6], 0 }
   0x2   :  { %21 = vsyncpa [#allocation4], 0 }
   0x3   :  { %22 = vsyncpa [#allocation10], 0  ;;  %s50_s27 = sshll.u32 %s1012_s6, 4  ;;  %s819_s28 = smov [#allocation5]   ;;  %s51_s27 = int_to_ptr.hbm [resolvable:$true] %s50_s27 }
   0x4   :  { %s52_s29 = sshll.u32 %s819_s28, 4  ;;  %s35_s15 = sshll.u32 %s1010_s4, 4  ;;  %s53_s29 = int_to_ptr.vmem [resolvable:$true] %s52_s29  ;;  %s36_s15 = int_to_ptr.hbm [resolvable:$true] %s35_s15 }
   0x5   :  { %s820_s16 = smov 128   ;;  %s821_s17 = smov 8  }
   0x6   :  { %58 = dma.hbm_to_vmem [thread:$0]  %s51_s27, 2048, %s53_s29, [#allocation6], %s820_s16, %s820_s16, %s821_s17  }
   0x7   :  { %s822_s18 = smov [#allocation2]   ;;  %s69_s22 = sshll.u32 %s1016_s10, 4  ;;  %s70_s22 = int_to_ptr.hbm [resolvable:$true] %s69_s22 }
   0x8   :  { %s37_s19 = sshll.u32 %s822_s18, 4  ;;  %s823_s6 = smov [#allocation7]   ;;  %s38_s19 = int_to_ptr.vmem [resolvable:$true] %s37_s19 }
   0x9   :  { %43 = dma.hbm_to_vmem [thread:$0]  %s36_s15, 512, %s38_s19, [#allocation3], %s820_s16, %s820_s16, %s821_s17  }
   0xa   :  { %s71_s23 = sshll.u32 %s823_s6, 4  ;;  %s72_s23 = int_to_ptr.vmem [resolvable:$true] %s71_s23 }
   0xb   :  { %77 = dma.hbm_to_vmem [thread:$0]  %s70_s22, 2048, %s72_s23, [#allocation6], %s820_s16, %s820_s16, %s821_s17  }
   0xc   :  { %811 = dma.done.wait [#allocation3], 512  }
   0xd   :  { %812 = vsyncadd [#allocation3], 4294966784 }
   0xe   :  { %813 = dma.done.wait [#allocation6], 4096  }
   0xf   :  { %814 = vsyncadd [#allocation6], 4294963200  ;;  %v824_v0 = vmov 0   ;;  %v92_v1 = vld [vmem:[%s1006_s0] sm:$0xff]  ;;  %v528_v6 = vld [vmem:[%s1014_s8 + $0x8] sm:$0xff]  ;;  %v514_v11 = vlaneseq  ;;  %vm416_vm0 = vcmask 130048  }
  0x10   :  { %676 = vset.pattern.permute.xlu0 %v824_v0  ;;  %677 = vset.pattern.permute.xlu1 %v824_v0  ;;  %v511_v2 = vld [vmem:[%s1008_s2] sm:$0xff]  ;;  %v825_v27 = vmov 683565275   ;;  %v826_v29 = vmov 2475754826   ;;  %s635_s20 = sshll.u32 %s1019_s13, 4  ;;  %s636_s20 = int_to_ptr.hbm [resolvable:$true] %s635_s20 }
  0x11   :  { %96 = vperm.xlu0 %676, %v92_v1   ;;  %v512_v3 = vsub.f32 1.0, %v511_v2  ;;  %v516_v5 = vld [vmem:[%s1007_s1] sm:$0xff]  ;;  %550 = vmatpush.msra.mxu2 %v528_v6  ;;  %v515_v14 = vand.u32 127, %v514_v11  ;;  %v827_v31 = vmov 2131351028   ;;  %s831_s1 = smov 16  }
  0x12   :  { %v527_v7 = vld [vmem:[%s1014_s8] sm:$0xff]  ;;  %v828_v33 = vmov 2102212464   ;;  %v829_v38 = vmov 920167782   ;;  %s833_s6 = smov [#allocation8]  }
  0x13   :  { %v513_v4 = vmul.f32 -1.0, %v512_v3  ;;  %551 = vmatpush.msra.mxu2 %v527_v7  ;;  %v678_v8 = vld [vmem:[%s1009_s3] ss:$0 sm:$0xff]  ;;  %v830_v41 = vmov 1326507024   ;;  %s622_s23 = sshll.u32 %s833_s6, 4  ;;  %s623_s23 = int_to_ptr.vmem [resolvable:$true] %s622_s23 }
  0x14   :  { %s624_s10 = sshll.u32 %s1018_s12, 4  ;;  %s625_s10 = int_to_ptr.hbm [resolvable:$true] %s624_s10 }
  0x15   :  { %523 = vperm.xlu1 %677, %v513_v4  }
  0x19   :  { %518 = vperm.xlu0 %676, %v516_v5  }
  0x83   :  { %v97_v9 = vpop.permute.xlu0 %96 }
  0x84   :  { %v933_v10 = vmul.f32 %v678_v8, %v97_v9 }
  0x86   :  { %v106_v12 = vand.u32 2139095040, %v933_v10  ;;  %v103_v15 = vand.u32 2147483647, %v933_v10  ;;  %vm105_vm14 = vcmp.lt.s32.totalorder %v933_v10, 0 }
  0x87   :  { %v524_v17 = vpop.permute.xlu1 %523 }
  0x88   :  { %v107_v13 = vshrl.u32 %v106_v12, 23  ;;  %v110_v20 = vand.u32 8388607, %v103_v15  ;;  %vm104_vm15 = vcmp.le.f32.partialorder %v103_v15, 0.7853982 }
  0x8a   :  { %v651_v16 = vadd.s32 4294967169, %v107_v13  ;;  %v111_v24 = vor.u32 8388608, %v110_v20 }
  0x8b   :  { %v519_v18 = vpop.permute.xlu0 %518 }
  0x8c   :  { %v113_v19 = vadd.s32 1, %v651_v16  ;;  %vm520_vm1 = vcmp.eq.s32.totalorder %v515_v14, %v519_v18  ;;  %v942_v43 = vshll.u32 %v111_v24, 8 }
  0x8d   :  { %v526_v21 = vsel %vm520_vm1, %v524_v17, 0.0 }
  0x8e   :  { %vm114_vm2 = vcmp.gt.s32.totalorder %v113_v19, 0  ;;  %659 = vmatmul.msk.f32.vlgmr.msra.gmra.mxu2 %vm416_vm0, %v526_v21  ;;  %v152_v55 = vand.u32 65535, %v942_v43  ;;  %v153_v57 = vshrl.u32 %v942_v43, 16 }
  0x8f   :  { %v115_v22 = vsel %vm114_vm2, %v113_v19, 0 }
  0x90   :  { %v117_v23 = vand.u32 31, %v115_v22  ;;  %v940_v25 = vshrl.u32 %v115_v22, 5 }
  0x92   :  { %v118_v26 = vsub.s32 32, %v117_v23  ;;  %v120_v28 = vshll.u32 %v825_v27, %v117_v23  ;;  %v123_v30 = vshll.u32 %v826_v29, %v117_v23  ;;  %v126_v32 = vshll.u32 %v827_v31, %v117_v23 }
  0x93   :  { %v129_v34 = vshll.u32 %v828_v33, %v117_v23  ;;  %v132_v40 = vshll.u32 %v829_v38, %v117_v23  ;;  %vm135_vm3 = vcmp.lt.s32.totalorder %v940_v25, 1  ;;  %vm138_vm4 = vcmp.lt.s32.totalorder %v940_v25, 4 }
  0x94   :  { %v121_v35 = vshrl.u32 %v826_v29, %v118_v26  ;;  %v124_v36 = vshrl.u32 %v827_v31, %v118_v26  ;;  %v127_v37 = vshrl.u32 %v828_v33, %v118_v26  ;;  %v130_v39 = vshrl.u32 %v829_v38, %v118_v26 }
  0x95   :  { %v133_v42 = vshrl.u32 %v830_v41, %v118_v26  ;;  %vm137_vm5 = vcmp.lt.s32.totalorder %v940_v25, 3  ;;  %vm136_vm6 = vcmp.lt.s32.totalorder %v940_v25, 2  ;;  %v119_v20 = vshrl.u32 %v825_v27, %v118_v26 }
  0x96   :  { %v122_v44 = vor.u32 %v121_v35, %v120_v28  ;;  %v125_v45 = vor.u32 %v124_v36, %v123_v30  ;;  %v128_v46 = vor.u32 %v127_v37, %v126_v32  ;;  %v131_v47 = vor.u32 %v130_v39, %v129_v34 }
  0x97   :  { %v134_v48 = vor.u32 %v133_v42, %v132_v40 }
  0x98   :  { %v143_v49 = vsel %vm135_vm3, %v122_v44, %v125_v45  ;;  %v144_v50 = vsel %vm138_vm4, %v131_v47, 920167782  ;;  %v147_v51 = vsel %vm135_vm3, %v125_v45, %v128_v46  ;;  %v140_v17 = vsel %vm138_vm4, %v128_v46, 2102212464 }
  0x99   :  { %v145_v52 = vsel %vm137_vm5, %v128_v46, %v144_v50  ;;  %v148_v53 = vsel %vm138_vm4, %v134_v48, 1326507024  ;;  %v139_v29 = vsel %vm135_vm3, %v119_v20, %v122_v44  ;;  %v141_v30 = vsel %vm137_vm5, %v125_v45, %v140_v17 }
  0x9a   :  { %v149_v54 = vsel %vm137_vm5, %v131_v47, %v148_v53  ;;  %v146_v56 = vsel %vm136_vm6, %v143_v49, %v145_v52  ;;  %v142_v27 = vsel %vm136_vm6, %v139_v29, %v141_v30 }
  0x9b   :  { %v150_v58 = vsel %vm136_vm6, %v147_v51, %v149_v54  ;;  %v176_v59 = vand.u32 65535, %v146_v56  ;;  %v177_v60 = vshrl.u32 %v146_v56, 16  ;;  %v196_v39 = vmul.u32 %v942_v43, %v142_v27  ;;  %v590_v27 = vld [vmem:[#allocation7 + $0x70] sm:$0xff] }
  0x9c   :  { %v154_v61 = vand.u32 65535, %v150_v58  ;;  %v155_v62 = vshrl.u32 %v150_v58, 16 }
  0x9d   :  { %v179_v63 = vmul.u32 %v177_v60, %v152_v55  ;;  %v180_v1 = vmul.u32 %v176_v59, %v153_v57  ;;  %v178_v4 = vmul.u32 %v176_v59, %v152_v55  ;;  %v181_v8 = vmul.u32 %v177_v60, %v153_v57 }
  0x9e   :  { %v157_v2 = vmul.u32 %v155_v62, %v152_v55  ;;  %v158_v3 = vmul.u32 %v154_v61, %v153_v57  ;;  %v156_v6 = vmul.u32 %v154_v61, %v152_v55  ;;  %v159_v9 = vmul.u32 %v155_v62, %v153_v57 }
  0x9f   :  { %v182_v5 = vshll.u32 %v179_v63, 16  ;;  %v184_v11 = vshll.u32 %v180_v1, 16  ;;  %v183_v24 = vshrl.u32 %v179_v63, 16  ;;  %v185_v33 = vshrl.u32 %v180_v1, 16 }
  0xa0   :  { %v160_v7 = vshll.u32 %v157_v2, 16  ;;  %v162_v13 = vshll.u32 %v158_v3, 16  ;;  %v161_v31 = vshrl.u32 %v157_v2, 16  ;;  %v163_v35 = vshrl.u32 %v158_v3, 16 }
  0xa1   :  { %vm186_vm7 = vc.u32 %v178_v4, %v182_v5  ;;  %v188_v12 = vadd.s32 %v182_v5, %v178_v4 }
  0xa2   :  { %vm164_vm8 = vc.u32 %v156_v6, %v160_v7  ;;  %v166_v14 = vadd.s32 %v160_v7, %v156_v6  ;;  %v187_v16 = vsel %vm186_vm7, 1, %v824_v0  ;;  %vm246_vm7 = vweird.f32 %v933_v10 }
  0xa3   :  { %v165_v18 = vsel %vm164_vm8, 1, %v824_v0  ;;  %v189_v19 = vadd.s32 %v187_v16, %v181_v8  ;;  %vm190_vm9 = vc.u32 %v188_v12, %v184_v11 }
  0xa4   :  { %v167_v21 = vadd.s32 %v165_v18, %v159_v9  ;;  %vm168_vm10 = vc.u32 %v166_v14, %v162_v13  ;;  %v191_v22 = vsel %vm190_vm9, 1, %v824_v0 }
  0xa5   :  { %v169_v23 = vsel %vm168_vm10, 1, %v824_v0  ;;  %v193_v28 = vadd.s32 %v191_v22, %v189_v19  ;;  %v192_v0 = vadd.s32 %v188_v12, %v184_v11 }
  0xa6   :  { %v171_v32 = vadd.s32 %v169_v23, %v167_v21 }
  0xa7   :  { %v194_v34 = vadd.s32 %v193_v28, %v183_v24 }
  0xa8   :  { %v172_v26 = vadd.s32 %v171_v32, %v161_v31 }
  0xa9   :  { %v195_v36 = vadd.s32 %v194_v34, %v185_v33 }
  0xaa   :  { %v173_v37 = vadd.s32 %v172_v26, %v163_v35  ;;  %v591_v26 = vld [vmem:[#allocation7 + $0x78] sm:$0xff] }
  0xab   :  { %v199_v38 = vadd.s32 1, %v195_v36  ;;  %596 = vmatpush.msra.mxu3 %v591_v26 }
  0xac   :  { %vm198_vm11 = vc.u32 %v173_v37, %v192_v0  ;;  %v197_v51 = vadd.s32 %v192_v0, %v173_v37  ;;  %v588_v37 = vld [vmem:[#allocation7 + $0x60] sm:$0xff]  ;;  %v587_v0 = vld [vmem:[#allocation7 + $0x58] sm:$0xff] }
  0xad   :  { %v200_v40 = vsel %vm198_vm11, %v199_v38, %v195_v36  ;;  %597 = vmatpush.msra.mxu3 %v590_v27  ;;  %v589_v36 = vld [vmem:[#allocation7 + $0x68] sm:$0xff]  ;;  %v586_v38 = vld [vmem:[#allocation7 + $0x50] sm:$0xff] }
  0xae   :  { %v201_v41 = vadd.s32 %v200_v40, %v196_v39  ;;  %v585_v39 = vld [vmem:[#allocation7 + $0x48] sm:$0xff]  ;;  %v583_v40 = vld [vmem:[#allocation7 + $0x38] sm:$0xff] }
  0xaf   :  { %598 = vmatpush.msra.mxu3 %v589_v36 }
  0xb0   :  { %v202_v42 = vadd.s32 536870912, %v201_v41 }
  0xb1   :  { %599 = vmatpush.msra.mxu3 %v588_v37 }
  0xb2   :  { %v203_v44 = vshrl.u32 %v202_v42, 30  ;;  %v581_v42 = vld [vmem:[#allocation7 + $0x28] sm:$0xff] }
  0xb3   :  { %600 = vmatpush.msra.mxu3 %v587_v0 }
  0xb4   :  { %v204_v45 = vshll.u32 %v203_v44, 30  ;;  %v227_v63 = vsub.s32 4, %v203_v44 }
  0xb5   :  { %601 = vmatpush.msra.mxu3 %v586_v38 }
  0xb6   :  { %v205_v46 = vsub.s32 %v201_v41, %v204_v45  ;;  %v228_v4 = vsel %vm105_vm14, %v227_v63, %v203_v44  ;;  %v582_v41 = vld [vmem:[#allocation7 + $0x30] sm:$0xff]  ;;  %v580_v44 = vld [vmem:[#allocation7 + $0x20] sm:$0xff]  ;;  %v579_v45 = vld [vmem:[#allocation7 + $0x18] sm:$0xff] }
  0xb7   :  { %v230_v7 = vsel %vm104_vm15, 0, %v228_v4  ;;  %602 = vmatpush.msra.mxu3 %v585_v39  ;;  %v418_v4 = vld [vmem:[#allocation2] sm:$0xff] }
  0xb8   :  { %vm206_vm12 = vcmp.lt.s32.totalorder %v205_v46, 0  ;;  %v207_v47 = vsub.s32 0, %v205_v46  ;;  %v247_v13 = vadd.s32 3, %v230_v7  ;;  %v402_v21 = vand.u32 3, %v230_v7  ;;  %v680_v7 = vld [vmem:[%s1017_s11] ss:$0 sm:$0xff] }
  0xba   :  { %v208_v48 = vsel %vm206_vm12, %v207_v47, %v205_v46  ;;  %v248_v19 = vand.u32 3, %v247_v13  ;;  %vm403_vm3 = vcmp.lt.s32.totalorder %v402_v21, 2  ;;  %vm404_vm4 = vcmp.eq.s32.totalorder %v402_v21, 0  ;;  %v679_v47 = vld [vmem:[%s1015_s9] ss:$0 sm:$0xff]  ;;  %v483_v13 = vld [vmem:[#allocation5 + $0x68] sm:$0xff] }
  0xbb   :  { %v209_v49 = vclz %v208_v48  ;;  %vm407_vm5 = vcmp.eq.s32.totalorder %v402_v21, 2  ;;  %v577_v48 = vld [vmem:[#allocation7 + $0x8] sm:$0xff]  ;;  %vm426_vm12 = vcmask 261120  }
  0xbc   :  { %vm253_vm1 = vcmp.eq.s32.totalorder %v248_v19, 2  ;;  %vm250_vm2 = vcmp.eq.s32.totalorder %v248_v19, 0  ;;  %vm249_vm6 = vcmp.lt.s32.totalorder %v248_v19, 2  ;;  %v478_v19 = vld [vmem:[#allocation5 + $0x40] sm:$0xff]  ;;  %v475_v21 = vld [vmem:[#allocation5 + $0x28] sm:$0xff] }
  0xbd   :  { %v652_v50 = vadd.s32 4294967294, %v209_v49 }
  0xbf   :  { %vm653_vm13 = vcmp.lt.s32.totalorder %v652_v50, 0 }
  0xc0   :  { %v212_v25 = vsel %vm653_vm13, 0, %v652_v50  ;;  %v576_v50 = vld [vmem:[#allocation7] sm:$0xff] }
  0xc1   :  { %v213_v52 = vsub.s32 32, %v212_v25  ;;  %v217_v53 = vsub.s32 4294967266, %v212_v25  ;;  %v214_v54 = vshll.u32 %v205_v46, %v212_v25  ;;  %v578_v46 = vld [vmem:[#allocation7 + $0x10] sm:$0xff] }
  0xc3   :  { %v215_v55 = vshrl.u32 %v197_v51, %v213_v52  ;;  %v218_v43 = vadd.s32 127, %v217_v53  ;;  %v421_v51 = vld [vmem:[#allocation2 + $0x18] sm:$0xff]  ;;  %v420_v52 = vld [vmem:[#allocation2 + $0x10] sm:$0xff] }
  0xc4   :  { %442 = vmatpush.msra.mxu0 %v421_v51 }
  0xc5   :  { %v216_v56 = vor.u32 %v215_v55, %v214_v54  ;;  %v219_v57 = vshll.u32 %v218_v43, 23  ;;  %v419_v54 = vld [vmem:[#allocation2 + $0x8] sm:$0xff] }
  0xc6   :  { %443 = vmatpush.msra.mxu0 %v420_v52 }
  0xc7   :  { %v220_v58 = vor.u32 4788187, %v219_v57  ;;  %v223_v60 = vcvt.s32.f32 %v216_v56 }
  0xc8   :  { %444 = vmatpush.msra.mxu0 %v419_v54 }
  0xc9   :  { %v221_v59 = vand.u32 2147483647, %v220_v58 }
  0xca   :  { %445 = vmatpush.msra.mxu0 %v418_v4 }
  0xcb   :  { %v224_v61 = vmul.f32 %v223_v60, %v221_v59 }
  0xcd   :  { %v225_v62 = vxor.u32 2147483648, %v224_v61 }
  0xcf   :  { %v226_v1 = vsel %vm105_vm14, %v225_v62, %v224_v61 }
  0xd0   :  { %v229_v2 = vsel %vm104_vm15, %v933_v10, %v226_v1  ;;  %v584_v10 = vld [vmem:[#allocation7 + $0x40] sm:$0xff] }
  0xd1   :  { %v231_v3 = vmul.f32 %v229_v2, %v229_v2  ;;  %603 = vmatpush.msra.mxu3 %v584_v10 }
  0xd3   :  { %v232_v5 = vmul.f32 -0.001358992, %v231_v3  ;;  %v239_v6 = vmul.f32 -0.00019511016, %v231_v3  ;;  %604 = vmatpush.msra.mxu3 %v583_v40 }
  0xd5   :  { %v233_v8 = vadd.f32 0.041655596, %v232_v5  ;;  %v240_v9 = vadd.f32 0.008332121, %v239_v6  ;;  %605 = vmatpush.msra.mxu3 %v582_v41 }
  0xd7   :  { %v234_v11 = vmul.f32 %v233_v8, %v231_v3  ;;  %v241_v12 = vmul.f32 %v240_v9, %v231_v3  ;;  %606 = vmatpush.msra.mxu3 %v581_v42 }
  0xd9   :  { %v235_v14 = vadd.f32 -0.4999988, %v234_v11  ;;  %v242_v16 = vadd.f32 -0.16666654, %v241_v12  ;;  %607 = vmatpush.msra.mxu3 %v580_v44  ;;  %v485_v11 = vld [vmem:[#allocation5 + $0x78] sm:$0xff]  ;;  %v484_v12 = vld [vmem:[#allocation5 + $0x70] sm:$0xff] }
  0xda   :  { %490 = vmatpush.msra.mxu1 %v485_v11  ;;  %v682_v44 = vld [vmem:[%s1013_s7] ss:$0 sm:$0xff] }
  0xdb   :  { %v236_v17 = vmul.f32 %v235_v14, %v231_v3  ;;  %v243_v18 = vmul.f32 %v242_v16, %v231_v3  ;;  %608 = vmatpush.msra.mxu3 %v579_v45  ;;  %v482_v14 = vld [vmem:[#allocation5 + $0x60] sm:$0xff]  ;;  %v481_v16 = vld [vmem:[#allocation5 + $0x58] sm:$0xff] }
  0xdc   :  { %491 = vmatpush.msra.mxu1 %v484_v12 }
  0xdd   :  { %v237_v20 = vadd.f32 1.0, %v236_v17  ;;  %v244_v15 = vadd.f32 1.0, %v243_v18  ;;  %609 = vmatpush.msra.mxu3 %v578_v46  ;;  %v480_v17 = vld [vmem:[#allocation5 + $0x50] sm:$0xff]  ;;  %v479_v18 = vld [vmem:[#allocation5 + $0x48] sm:$0xff] }
  0xde   :  { %492 = vmatpush.msra.mxu1 %v483_v13 }
  0xdf   :  { %v245_v22 = vmul.f32 %v244_v15, %v229_v2  ;;  %v254_v23 = vxor.u32 2147483648, %v237_v20  ;;  %610 = vmatpush.msra.mxu3 %v577_v48  ;;  %v476_v15 = vld [vmem:[#allocation5 + $0x30] sm:$0xff] }
  0xe0   :  { %493 = vmatpush.msra.mxu1 %v482_v14 }
  0xe1   :  { %v251_v24 = vxor.u32 2147483648, %v245_v22  ;;  %v255_v28 = vsel %vm253_vm1, %v254_v23, %v245_v22  ;;  %v409_v30 = vsel %vm407_vm5, %v254_v23, %v245_v22  ;;  %611 = vmatpush.msra.mxu3 %v576_v50  ;;  %v474_v22 = vld [vmem:[#allocation5 + $0x20] sm:$0xff]  ;;  %v473_v23 = vld [vmem:[#allocation5 + $0x18] sm:$0xff] }
  0xe2   :  { %494 = vmatpush.msra.mxu1 %v481_v16 }
  0xe3   :  { %v406_v29 = vsel %vm404_vm4, %v237_v20, %v251_v24  ;;  %v252_v31 = vsel %vm250_vm2, %v237_v20, %v251_v24  ;;  %v477_v20 = vld [vmem:[#allocation5 + $0x38] sm:$0xff]  ;;  %v472_v24 = vld [vmem:[#allocation5 + $0x10] sm:$0xff] }
  0xe4   :  { %v410_v32 = vsel %vm403_vm3, %v406_v29, %v409_v30  ;;  %v256_v33 = vsel %vm249_vm6, %v252_v31, %v255_v28  ;;  %495 = vmatpush.msra.mxu1 %v480_v17  ;;  %v681_v28 = vld [vmem:[%s1011_s5] ss:$0 sm:$0xff]  ;;  %v471_v29 = vld [vmem:[#allocation5 + $0x8] sm:$0xff]  ;;  %s832_s5 = smov [#allocation9]  }
  0xe5   :  { %v411_v34 = vsel %vm246_vm7, nan, %v410_v32  ;;  %v984_v35 = vsel %vm246_vm7, nan, %v256_v33  ;;  %v470_v31 = vld [vmem:[#allocation5] sm:$0xff]  ;;  %s633_s17 = sshll.u32 %s832_s5, 4  ;;  %s634_s17 = int_to_ptr.vmem [resolvable:$true] %s633_s17 }
  0xe6   :  { %413 = vrot.lane.b32.xlu1 %v411_v34, %s831_s1  ;;  %496 = vmatpush.msra.mxu1 %v479_v18 }
  0xe8   :  { %497 = vmatpush.msra.mxu1 %v478_v19 }
  0xea   :  { %498 = vmatpush.msra.mxu1 %v477_v20 }
  0xec   :  { %499 = vmatpush.msra.mxu1 %v476_v15 }
  0xee   :  { %500 = vmatpush.msra.mxu1 %v475_v21 }
  0xf0   :  { %501 = vmatpush.msra.mxu1 %v474_v22 }
  0xf2   :  { %502 = vmatpush.msra.mxu1 %v473_v23 }
  0xf4   :  { %503 = vmatpush.msra.mxu1 %v472_v24 }
  0xf6   :  { %504 = vmatpush.msra.mxu1 %v471_v29 }
  0xf8   :  { %505 = vmatpush.msra.mxu1 %v470_v31 }
 0x111   :  { %v553_v49 = vpop.f32.mrf.mxu2 }
 0x112   :  { %v554_v25 = vadd.f32 %v679_v47, %v553_v49 }
 0x114   :  { %v660_v53 = vmul.f32 -1.442695, %v554_v25 }
 0x116   :  { %683 = vpow2.f32 %v660_v53 }
 0x11c   :  { %v684_v55 = vpop.eup %683 }
 0x11d   :  { %v559_v43 = vadd.f32 1.0, %v684_v55 }
 0x11f   :  { %685 = vrcp.f32 %v559_v43  ;;  %v571_v59 = vand.u32 2147483648, %v559_v43  ;;  %v569_v61 = vand.u32 2147483647, %v559_v43  ;;  %vm565_vm9 = vweird.f32 %v559_v43 }
 0x121   :  { %v572_v63 = vor.u32 1.1754944e-38, %v571_v59  ;;  %vm570_vm11 = vcmp.eq.f32.partialorder %v569_v61, 8.507059e+37 }
 0x125   :  { %v686_v56 = vpop.eup %685 }
 0x126   :  { %v561_v57 = vmul.f32 %v686_v56, %v559_v43  ;;  %vm566_vm8 = vweird.f32 %v686_v56 }
 0x127   :  { %vm567_vm10 = vmor %vm565_vm9, %vm566_vm8 }
 0x128   :  { %v562_v58 = vsub.f32 1.0, %v561_v57 }
 0x12a   :  { %v563_v60 = vmul.f32 %v686_v56, %v562_v58 }
 0x12c   :  { %v564_v62 = vadd.f32 %v686_v56, %v563_v60 }
 0x12e   :  { %v568_v1 = vsel %vm567_vm10, %v686_v56, %v564_v62 }
 0x12f   :  { %v573_v2 = vsel %vm570_vm11, %v572_v63, %v568_v1 }
 0x130   :  { %v575_v3 = vmul.f32 %v573_v2, %v554_v25 }
 0x132   :  { %612 = vmatmul.f32.vlgmr.msra.gmra.mxu3 %v575_v3 }
 0x158   :  { %v414_v5 = vpop.permute.xlu1 %413 }
 0x159   :  { %v417_v6 = vsel %vm416_vm0, %v984_v35, %v414_v5 }
 0x15a   :  { %657 = vmatmul.msk.f32.vlgmr.msra.gmra.mxu0 %vm426_vm12, %v417_v6 }
 0x1b5   :  { %v613_v8 = vpop.f32.mrf.mxu3 }
 0x1b6   :  { %v614_v9 = vadd.f32 %v680_v7, %v613_v8 }
 0x1b8   :  { %616 = vst [vmem:[#allocation9] sm:$0xff] %v614_v9 }
 0x1b9   :  { %638 = dma.vmem_to_hbm [thread:$0]  %s634_s17, 128, %s636_s20, [#allocation10]  }
 0x1d7   :  { %v447_v30 = vpop.f32.mrf.mxu0 }
 0x1d8   :  { %v448_v32 = vadd.f32 %v681_v28, %v447_v30 }
 0x1da   :  { %v658_v33 = vmul.f32 -1.442695, %v448_v32 }
 0x1dc   :  { %687 = vpow2.f32 %v658_v33 }
 0x1e2   :  { %v688_v34 = vpop.eup %687 }
 0x1e3   :  { %v453_v35 = vadd.f32 1.0, %v688_v34 }
 0x1e5   :  { %689 = vrcp.f32 %v453_v35  ;;  %v465_v37 = vand.u32 2147483648, %v453_v35  ;;  %v463_v38 = vand.u32 2147483647, %v453_v35  ;;  %vm459_vm13 = vweird.f32 %v453_v35 }
 0x1e7   :  { %v466_v10 = vor.u32 1.1754944e-38, %v465_v37  ;;  %vm464_vm15 = vcmp.eq.f32.partialorder %v463_v38, 8.507059e+37 }
 0x1eb   :  { %v690_v26 = vpop.eup %689 }
 0x1ec   :  { %v455_v27 = vmul.f32 %v690_v26, %v453_v35  ;;  %vm460_vm0 = vweird.f32 %v690_v26 }
 0x1ed   :  { %vm461_vm14 = vmor %vm459_vm13, %vm460_vm0 }
 0x1ee   :  { %v456_v36 = vsub.f32 1.0, %v455_v27 }
 0x1f0   :  { %v457_v0 = vmul.f32 %v690_v26, %v456_v36 }
 0x1f2   :  { %v458_v39 = vadd.f32 %v690_v26, %v457_v0 }
 0x1f4   :  { %v462_v40 = vsel %vm461_vm14, %v690_v26, %v458_v39 }
 0x1f5   :  { %v467_v41 = vsel %vm464_vm15, %v466_v10, %v462_v40 }
 0x1f6   :  { %v469_v42 = vmul.f32 %v467_v41, %v448_v32 }
 0x1f8   :  { %506 = vmatmul.f32.vlgmr.msra.gmra.mxu1 %v469_v42 }
 0x275   :  { %v507_v45 = vpop.f32.mrf.mxu1 }
 0x276   :  { %v508_v46 = vadd.f32 %v682_v44, %v507_v45 }
 0x278   :  { %510 = vst [vmem:[#allocation8] sm:$0xff] %v508_v46 }
 0x279   :  { %627 = dma.vmem_to_hbm [thread:$0]  %s623_s23, 128, %s625_s10, [#allocation4]  }
 0x27a   :  { %815 = dma.done.wait [#allocation4], 128  }
 0x27b   :  { %816 = vsyncadd [#allocation4], 4294967168 }
 0x27c   :  { %817 = dma.done.wait [#allocation10], 128  }
 0x27d   :  { %818 = vsyncadd [#allocation10], 4294967168 }
 0x27e   :  { %647 = vsyncpa [#allocation3], 1 }
 0x27f   :  { %648 = vsyncpa [#allocation6], 1 }
 0x280   :  { %649 = vsyncpa [#allocation4], 1 }
 0x281   :  { %650 = vsyncpa [#allocation10], 1 }

</bundles_post_ra>
